<compile_context>
chip_gen: v5e
topology: v5e:2x2
jax: 0.10.0
libtpu: 0.0.40
codegen_flags: <defaults>
</compile_context>

<pallas_src>
from functools import reduce

import jax
import jax.numpy as jnp
from jax.experimental import pallas as pl
from jax.experimental.pallas import tpu as pltpu

LANG_NAMES = ["en", "de", "fr", "es"]  # 4 synthetic languages
LANE = 128
SUBLANE = 8


def _round_up(x, m):
    return ((x + m - 1) // m) * m


# ----------------------------------------------------------------------------
# Fused Pallas kernel: one invocation produces theta for ALL groups.
#   out[g, :] = L^T[lang_g, :] @ M_stack[g]      (M_stack[g] = P_g^T @ W_g^T)
# ----------------------------------------------------------------------------
def _cpg_fused_kernel(langs_ref, lflat_ref, m_ref, out_ref):
    # langs_ref : SMEM (group_num,)                int32 language id per group
    # lflat_ref : SMEM (num_lang * lang_embed,)    L^T flattened row-major
    # m_ref     : VMEM (group_num, lang_embed, max_pad) folded generator weights
    # out_ref   : VMEM (group_pad, max_pad)        dense theta slab (one store)
    group_num, lang_embed, max_pad = m_ref.shape
    group_pad = out_ref.shape[0]

    rows = []
    for g in range(group_num):                       # static unroll (G is tiny)
        lang = langs_ref[g]
        base = lang * lang_embed
        mg = m_ref[g]                                # (lang_embed, max_pad) value
        # VPU broadcast-FMA GEMV: theta = sum_e ell[e] * M[g, e, :]
        acc = lflat_ref[base] * mg[0:1, :]
        for e in range(1, lang_embed):
            acc = acc + lflat_ref[base + e] * mg[e:e + 1, :]
        rows.append(acc)                             # (1, max_pad)
    if group_pad > group_num:
        rows.append(jnp.zeros((group_pad - group_num, max_pad), jnp.float32))
    # Single dense (group_pad, max_pad) store -> full vregs, unmasked vst.
    out_ref[...] = jnp.concatenate(rows, axis=0)


def cpg_generate_all(langs, lflat, m_stack, group_pad):
    """One pallas_call producing the padded theta slab for all groups."""
    group_num, lang_embed, max_pad = m_stack.shape
    bytes_accessed = 4 * (m_stack.size + lflat.size + langs.size + group_pad * max_pad)
    return pl.pallas_call(
        _cpg_fused_kernel,
        out_shape=jax.ShapeDtypeStruct((group_pad, max_pad), jnp.float32),
        grid=(1,),
        in_specs=[
            pl.BlockSpec(memory_space=pltpu.MemorySpace.SMEM),   # langs
            pl.BlockSpec(memory_space=pltpu.MemorySpace.SMEM),   # L^T flattened
            pl.BlockSpec((group_num, lang_embed, max_pad), lambda i: (0, 0, 0)),
        ],
        out_specs=pl.BlockSpec((group_pad, max_pad), lambda i: (0, 0)),
        compiler_params=pltpu.CompilerParams(dimension_semantics=("arbitrary",)),
        cost_estimate=pl.CostEstimate(
            flops=2 * group_num * lang_embed * max_pad,
            transcendentals=0,
            bytes_accessed=bytes_accessed,
        ),
    )(langs, lflat, m_stack)


# ----------------------------------------------------------------------------
# Module-equivalent wrapper (parameter setup + split/reshape glue)
# ----------------------------------------------------------------------------
def get_param_meta(shapes):
    group_num = len(shapes)
    group_param_num, group_param_sizes = [], []
    for group in shapes:
        sizes = [reduce(lambda a, d: a * d, s, 1) for s in group]
        group_param_num.append(sizes)
        group_param_sizes.append(sum(sizes))
    return group_num, group_param_num, group_param_sizes


class CPGPallas:
    def __init__(self, shapes, args, key):
        self.lang_embed_size = int(args["--lang-embed-size"])
        self.word_embed_size = int(args["--embed-size"])
        self.vocab_size = int(args["--vocab-size"])
        self.low_rank = int(args["--low-rank"])
        self.num_lang = len(LANG_NAMES)
        self.shapes = shapes
        self.group_num, self.group_param_num, self.group_param_sizes = get_param_meta(shapes)
        # Lane-dense common theta width, sublane-dense group count.
        self.max_pad = max(_round_up(s, LANE) for s in self.group_param_sizes)
        self.group_pad = _round_up(self.group_num, SUBLANE)

        # Deterministic init, uniform(-0.1, 0.1), matching nn.init.uniform_.
        def uni(k, shape):
            return jax.random.uniform(k, shape, jnp.float32, minval=-0.1, maxval=0.1)

        n_keys = 1 + 2 * self.group_num + self.num_lang
        keys = jax.random.split(key, n_keys)
        ki = iter(range(n_keys))

        # Transposed weights so the math is plain row-major: ell = onehot @ L^T.
        self.L_w_t = uni(keys[next(ki)], (self.num_lang, self.lang_embed_size))
        self.P_w_t = [uni(keys[next(ki)], (self.lang_embed_size, self.low_rank))
                      for _ in range(self.group_num)]
        self.W_w_t = [uni(keys[next(ki)], (self.low_rank, self.group_param_sizes[j]))
                      for j in range(self.group_num)]
        # nn.Embedding(vocab, embed) tables (returned as-is by get_embedding).
        self.word_embeddings = [uni(keys[next(ki)], (self.vocab_size, self.word_embed_size))
                                for _ in range(self.num_lang)]
        self.lang_encode = jnp.eye(self.num_lang, dtype=jnp.float32)

        # Stacked / zero-padded generator weights (f32; no bf16 cast at this size).
        self.P_stack = jnp.stack(self.P_w_t)                       # (G, E, r)
        self.W_stack = jnp.stack([
            jnp.pad(w, ((0, 0), (0, self.max_pad - w.shape[1])))
            for w in self.W_w_t
        ])                                                          # (G, r, max_pad)

        # Jit the full generate path; weights are explicit args (not baked in).
        self._generate_jit = jax.jit(self._generate)

    # ----- fused generation path (jitted) -----------------------------------
    def _generate(self, langs_arr, lw_t, p_stack, w_stack):
        # Fold the low-rank chain at trace time; XLA constant-folds this for
        # fixed weights and it is trivial even when weights are traced.
        m_stack = jnp.einsum("ger,grn->gen", p_stack, w_stack)     # (G, E, max_pad)
        lflat = lw_t.reshape(-1)                                    # (num_lang*E,)
        theta_pad = cpg_generate_all(langs_arr, lflat, m_stack, self.group_pad)
        grouped = []
        for j in range(self.group_num):
            theta = theta_pad[j, : self.group_param_sizes[j]]       # drop zero padding
            tensors, off = [], 0
            for i, size in enumerate(self.group_param_num[j]):
                tensors.append(theta[off:off + size].reshape(self.shapes[j][i]))
                off += size
            grouped.append(tensors)
        return grouped

    def get_params(self, langs):
        assert len(langs) == self.group_num
        return self._generate_jit(jnp.asarray(langs, dtype=jnp.int32),
                                  self.L_w_t, self.P_stack, self.W_stack)

    def get_embedding(self, lang):
        # TODO(synk): plain table return (matches nn.Embedding module handoff); no kernel needed.
        return self.word_embeddings[lang]

    # Pure-JAX reference (mirrors the PyTorch one-hot -> L -> P_j -> W_j chain).
    def get_params_ref(self, langs):
        grouped = []
        for j in range(self.group_num):
            onehot = self.lang_encode[langs[j]]
            ell = onehot @ self.L_w_t
            theta = (ell @ self.P_w_t[j]) @ self.W_w_t[j]
            tensors, off = [], 0
            for i, size in enumerate(self.group_param_num[j]):
                tensors.append(theta[off:off + size].reshape(self.shapes[j][i]))
                off += size
            grouped.append(tensors)
        return grouped


if __name__ == "__main__":
    args = {
        "--lang-embed-size": "8",
        "--embed-size": "16",
        "--vocab-size": "32",
        "--low-rank": "4",
    }
    # Three parameter groups with mixed shapes (e.g. small RNN/linear params).
    shapes = [
        [(4, 16), (4,)],        # group 0: 68 generated params
        [(16, 16)],             # group 1: 256 generated params
        [(8, 16), (16,)],       # group 2: 144 generated params
    ]
    model = CPGPallas(shapes, args, jax.random.PRNGKey(0))

    langs = [0, 2, 1]  # one language index per group
    out = model.get_params(langs)
    ref = model.get_params_ref(langs)

    # Block on results and check against the pure-JAX reference.
    for g_out, g_ref, g_shapes in zip(out, ref, shapes):
        for t_out, t_ref, shp in zip(g_out, g_ref, g_shapes):
            t_out = jax.block_until_ready(t_out)
            assert t_out.shape == tuple(shp), (t_out.shape, shp)
            assert jnp.allclose(t_out, t_ref, atol=1e-5, rtol=1e-5)

    # Embedding lookup path (get_embedding simply returns the table).
    emb = jax.block_until_ready(model.get_embedding(1))
    assert emb.shape == (int(args["--vocab-size"]), int(args["--embed-size"]))

    print("KERNEL_OK")
</pallas_src>

<mosaic_0001>
module attributes {stable_mosaic.version = 11 : i64} {
  func.func @_cpg_fused_kernel(%arg0: i32, %arg1: memref<3xi32, #tpu.memory_space<smem>>, %arg2: memref<32xf32, #tpu.memory_space<smem>>, %arg3: memref<3x8x256xf32, #tpu.memory_space<vmem>>, %arg4: memref<8x256xf32, #tpu.memory_space<vmem>>) attributes {dimension_semantics = [#tpu.dimension_semantics<arbitrary>], iteration_bounds = array<i64: 1>, scalar_prefetch = 0 : i64, scratch_operands = 0 : i64, tpu.core_type = #tpu.core_type<tc>, window_params = [{transform_indices = @transform_0, window_bounds = array<i64: 3>}, {transform_indices = @transform_1, window_bounds = array<i64: 32>}, {pipeline_mode = #tpu.pipeline_mode<synchronous>, transform_indices = @transform_2, window_bounds = array<i64: 3, 8, 256>}, {pipeline_mode = #tpu.pipeline_mode<synchronous>, transform_indices = @transform_3, window_bounds = array<i64: 8, 256>}]} {
    %c0 = arith.constant 0 : index
    %0 = memref.load %arg1[%c0] : memref<3xi32, #tpu.memory_space<smem>>
    %c8_i32 = arith.constant 8 : i32
    %1 = arith.muli %0, %c8_i32 : i32
    %c0_0 = arith.constant 0 : index
    %c0_1 = arith.constant 0 : index
    %c0_2 = arith.constant 0 : index
    %2 = vector.load %arg3[%c0_0, %c0_1, %c0_2] : memref<3x8x256xf32, #tpu.memory_space<vmem>>, vector<1x8x256xf32>
    %3 = vector.shape_cast %2 : vector<1x8x256xf32> to vector<8x256xf32>
    %4 = arith.index_cast %1 : i32 to index
    %5 = memref.load %arg2[%4] : memref<32xf32, #tpu.memory_space<smem>>
    %6 = vector.extract_strided_slice %3 {offsets = [0, 0], sizes = [1, 256], strides = [1, 1]} : vector<8x256xf32> to vector<1x256xf32>
    %7 = vector.broadcast %5 : f32 to vector<1x256xf32>
    %8 = arith.mulf %7, %6 : vector<1x256xf32>
    %c1_i32 = arith.constant 1 : i32
    %9 = arith.addi %1, %c1_i32 : i32
    %10 = arith.index_cast %9 : i32 to index
    %11 = memref.load %arg2[%10] : memref<32xf32, #tpu.memory_space<smem>>
    %12 = vector.extract_strided_slice %3 {offsets = [1, 0], sizes = [1, 256], strides = [1, 1]} : vector<8x256xf32> to vector<1x256xf32>
    %13 = vector.broadcast %11 : f32 to vector<1x256xf32>
    %14 = arith.mulf %13, %12 : vector<1x256xf32>
    %15 = arith.addf %8, %14 : vector<1x256xf32>
    %c2_i32 = arith.constant 2 : i32
    %16 = arith.addi %1, %c2_i32 : i32
    %17 = arith.index_cast %16 : i32 to index
    %18 = memref.load %arg2[%17] : memref<32xf32, #tpu.memory_space<smem>>
    %19 = vector.extract_strided_slice %3 {offsets = [2, 0], sizes = [1, 256], strides = [1, 1]} : vector<8x256xf32> to vector<1x256xf32>
    %20 = vector.broadcast %18 : f32 to vector<1x256xf32>
    %21 = arith.mulf %20, %19 : vector<1x256xf32>
    %22 = arith.addf %15, %21 : vector<1x256xf32>
    %c3_i32 = arith.constant 3 : i32
    %23 = arith.addi %1, %c3_i32 : i32
    %24 = arith.index_cast %23 : i32 to index
    %25 = memref.load %arg2[%24] : memref<32xf32, #tpu.memory_space<smem>>
    %26 = vector.extract_strided_slice %3 {offsets = [3, 0], sizes = [1, 256], strides = [1, 1]} : vector<8x256xf32> to vector<1x256xf32>
    %27 = vector.broadcast %25 : f32 to vector<1x256xf32>
    %28 = arith.mulf %27, %26 : vector<1x256xf32>
    %29 = arith.addf %22, %28 : vector<1x256xf32>
    %c4_i32 = arith.constant 4 : i32
    %30 = arith.addi %1, %c4_i32 : i32
    %31 = arith.index_cast %30 : i32 to index
    %32 = memref.load %arg2[%31] : memref<32xf32, #tpu.memory_space<smem>>
    %33 = vector.extract_strided_slice %3 {offsets = [4, 0], sizes = [1, 256], strides = [1, 1]} : vector<8x256xf32> to vector<1x256xf32>
    %34 = vector.broadcast %32 : f32 to vector<1x256xf32>
    %35 = arith.mulf %34, %33 : vector<1x256xf32>
    %36 = arith.addf %29, %35 : vector<1x256xf32>
    %c5_i32 = arith.constant 5 : i32
    %37 = arith.addi %1, %c5_i32 : i32
    %38 = arith.index_cast %37 : i32 to index
    %39 = memref.load %arg2[%38] : memref<32xf32, #tpu.memory_space<smem>>
    %40 = vector.extract_strided_slice %3 {offsets = [5, 0], sizes = [1, 256], strides = [1, 1]} : vector<8x256xf32> to vector<1x256xf32>
    %41 = vector.broadcast %39 : f32 to vector<1x256xf32>
    %42 = arith.mulf %41, %40 : vector<1x256xf32>
    %43 = arith.addf %36, %42 : vector<1x256xf32>
    %c6_i32 = arith.constant 6 : i32
    %44 = arith.addi %1, %c6_i32 : i32
    %45 = arith.index_cast %44 : i32 to index
    %46 = memref.load %arg2[%45] : memref<32xf32, #tpu.memory_space<smem>>
    %47 = vector.extract_strided_slice %3 {offsets = [6, 0], sizes = [1, 256], strides = [1, 1]} : vector<8x256xf32> to vector<1x256xf32>
    %48 = vector.broadcast %46 : f32 to vector<1x256xf32>
    %49 = arith.mulf %48, %47 : vector<1x256xf32>
    %50 = arith.addf %43, %49 : vector<1x256xf32>
    %c7_i32 = arith.constant 7 : i32
    %51 = arith.addi %1, %c7_i32 : i32
    %52 = arith.index_cast %51 : i32 to index
    %53 = memref.load %arg2[%52] : memref<32xf32, #tpu.memory_space<smem>>
    %54 = vector.extract_strided_slice %3 {offsets = [7, 0], sizes = [1, 256], strides = [1, 1]} : vector<8x256xf32> to vector<1x256xf32>
    %55 = vector.broadcast %53 : f32 to vector<1x256xf32>
    %56 = arith.mulf %55, %54 : vector<1x256xf32>
    %57 = arith.addf %50, %56 : vector<1x256xf32>
    %c1 = arith.constant 1 : index
    %58 = memref.load %arg1[%c1] : memref<3xi32, #tpu.memory_space<smem>>
    %c8_i32_3 = arith.constant 8 : i32
    %59 = arith.muli %58, %c8_i32_3 : i32
    %c1_4 = arith.constant 1 : index
    %c0_5 = arith.constant 0 : index
    %c0_6 = arith.constant 0 : index
    %60 = vector.load %arg3[%c1_4, %c0_5, %c0_6] : memref<3x8x256xf32, #tpu.memory_space<vmem>>, vector<1x8x256xf32>
    %61 = vector.shape_cast %60 : vector<1x8x256xf32> to vector<8x256xf32>
    %62 = arith.index_cast %59 : i32 to index
    %63 = memref.load %arg2[%62] : memref<32xf32, #tpu.memory_space<smem>>
    %64 = vector.extract_strided_slice %61 {offsets = [0, 0], sizes = [1, 256], strides = [1, 1]} : vector<8x256xf32> to vector<1x256xf32>
    %65 = vector.broadcast %63 : f32 to vector<1x256xf32>
    %66 = arith.mulf %65, %64 : vector<1x256xf32>
    %c1_i32_7 = arith.constant 1 : i32
    %67 = arith.addi %59, %c1_i32_7 : i32
    %68 = arith.index_cast %67 : i32 to index
    %69 = memref.load %arg2[%68] : memref<32xf32, #tpu.memory_space<smem>>
    %70 = vector.extract_strided_slice %61 {offsets = [1, 0], sizes = [1, 256], strides = [1, 1]} : vector<8x256xf32> to vector<1x256xf32>
    %71 = vector.broadcast %69 : f32 to vector<1x256xf32>
    %72 = arith.mulf %71, %70 : vector<1x256xf32>
    %73 = arith.addf %66, %72 : vector<1x256xf32>
    %c2_i32_8 = arith.constant 2 : i32
    %74 = arith.addi %59, %c2_i32_8 : i32
    %75 = arith.index_cast %74 : i32 to index
    %76 = memref.load %arg2[%75] : memref<32xf32, #tpu.memory_space<smem>>
    %77 = vector.extract_strided_slice %61 {offsets = [2, 0], sizes = [1, 256], strides = [1, 1]} : vector<8x256xf32> to vector<1x256xf32>
    %78 = vector.broadcast %76 : f32 to vector<1x256xf32>
    %79 = arith.mulf %78, %77 : vector<1x256xf32>
    %80 = arith.addf %73, %79 : vector<1x256xf32>
    %c3_i32_9 = arith.constant 3 : i32
    %81 = arith.addi %59, %c3_i32_9 : i32
    %82 = arith.index_cast %81 : i32 to index
    %83 = memref.load %arg2[%82] : memref<32xf32, #tpu.memory_space<smem>>
    %84 = vector.extract_strided_slice %61 {offsets = [3, 0], sizes = [1, 256], strides = [1, 1]} : vector<8x256xf32> to vector<1x256xf32>
    %85 = vector.broadcast %83 : f32 to vector<1x256xf32>
    %86 = arith.mulf %85, %84 : vector<1x256xf32>
    %87 = arith.addf %80, %86 : vector<1x256xf32>
    %c4_i32_10 = arith.constant 4 : i32
    %88 = arith.addi %59, %c4_i32_10 : i32
    %89 = arith.index_cast %88 : i32 to index
    %90 = memref.load %arg2[%89] : memref<32xf32, #tpu.memory_space<smem>>
    %91 = vector.extract_strided_slice %61 {offsets = [4, 0], sizes = [1, 256], strides = [1, 1]} : vector<8x256xf32> to vector<1x256xf32>
    %92 = vector.broadcast %90 : f32 to vector<1x256xf32>
    %93 = arith.mulf %92, %91 : vector<1x256xf32>
    %94 = arith.addf %87, %93 : vector<1x256xf32>
    %c5_i32_11 = arith.constant 5 : i32
    %95 = arith.addi %59, %c5_i32_11 : i32
    %96 = arith.index_cast %95 : i32 to index
    %97 = memref.load %arg2[%96] : memref<32xf32, #tpu.memory_space<smem>>
    %98 = vector.extract_strided_slice %61 {offsets = [5, 0], sizes = [1, 256], strides = [1, 1]} : vector<8x256xf32> to vector<1x256xf32>
    %99 = vector.broadcast %97 : f32 to vector<1x256xf32>
    %100 = arith.mulf %99, %98 : vector<1x256xf32>
    %101 = arith.addf %94, %100 : vector<1x256xf32>
    %c6_i32_12 = arith.constant 6 : i32
    %102 = arith.addi %59, %c6_i32_12 : i32
    %103 = arith.index_cast %102 : i32 to index
    %104 = memref.load %arg2[%103] : memref<32xf32, #tpu.memory_space<smem>>
    %105 = vector.extract_strided_slice %61 {offsets = [6, 0], sizes = [1, 256], strides = [1, 1]} : vector<8x256xf32> to vector<1x256xf32>
    %106 = vector.broadcast %104 : f32 to vector<1x256xf32>
    %107 = arith.mulf %106, %105 : vector<1x256xf32>
    %108 = arith.addf %101, %107 : vector<1x256xf32>
    %c7_i32_13 = arith.constant 7 : i32
    %109 = arith.addi %59, %c7_i32_13 : i32
    %110 = arith.index_cast %109 : i32 to index
    %111 = memref.load %arg2[%110] : memref<32xf32, #tpu.memory_space<smem>>
    %112 = vector.extract_strided_slice %61 {offsets = [7, 0], sizes = [1, 256], strides = [1, 1]} : vector<8x256xf32> to vector<1x256xf32>
    %113 = vector.broadcast %111 : f32 to vector<1x256xf32>
    %114 = arith.mulf %113, %112 : vector<1x256xf32>
    %115 = arith.addf %108, %114 : vector<1x256xf32>
    %c2 = arith.constant 2 : index
    %116 = memref.load %arg1[%c2] : memref<3xi32, #tpu.memory_space<smem>>
    %c8_i32_14 = arith.constant 8 : i32
    %117 = arith.muli %116, %c8_i32_14 : i32
    %c2_15 = arith.constant 2 : index
    %c0_16 = arith.constant 0 : index
    %c0_17 = arith.constant 0 : index
    %118 = vector.load %arg3[%c2_15, %c0_16, %c0_17] : memref<3x8x256xf32, #tpu.memory_space<vmem>>, vector<1x8x256xf32>
    %119 = vector.shape_cast %118 : vector<1x8x256xf32> to vector<8x256xf32>
    %120 = arith.index_cast %117 : i32 to index
    %121 = memref.load %arg2[%120] : memref<32xf32, #tpu.memory_space<smem>>
    %122 = vector.extract_strided_slice %119 {offsets = [0, 0], sizes = [1, 256], strides = [1, 1]} : vector<8x256xf32> to vector<1x256xf32>
    %123 = vector.broadcast %121 : f32 to vector<1x256xf32>
    %124 = arith.mulf %123, %122 : vector<1x256xf32>
    %c1_i32_18 = arith.constant 1 : i32
    %125 = arith.addi %117, %c1_i32_18 : i32
    %126 = arith.index_cast %125 : i32 to index
    %127 = memref.load %arg2[%126] : memref<32xf32, #tpu.memory_space<smem>>
    %128 = vector.extract_strided_slice %119 {offsets = [1, 0], sizes = [1, 256], strides = [1, 1]} : vector<8x256xf32> to vector<1x256xf32>
    %129 = vector.broadcast %127 : f32 to vector<1x256xf32>
    %130 = arith.mulf %129, %128 : vector<1x256xf32>
    %131 = arith.addf %124, %130 : vector<1x256xf32>
    %c2_i32_19 = arith.constant 2 : i32
    %132 = arith.addi %117, %c2_i32_19 : i32
    %133 = arith.index_cast %132 : i32 to index
    %134 = memref.load %arg2[%133] : memref<32xf32, #tpu.memory_space<smem>>
    %135 = vector.extract_strided_slice %119 {offsets = [2, 0], sizes = [1, 256], strides = [1, 1]} : vector<8x256xf32> to vector<1x256xf32>
    %136 = vector.broadcast %134 : f32 to vector<1x256xf32>
    %137 = arith.mulf %136, %135 : vector<1x256xf32>
    %138 = arith.addf %131, %137 : vector<1x256xf32>
    %c3_i32_20 = arith.constant 3 : i32
    %139 = arith.addi %117, %c3_i32_20 : i32
    %140 = arith.index_cast %139 : i32 to index
    %141 = memref.load %arg2[%140] : memref<32xf32, #tpu.memory_space<smem>>
    %142 = vector.extract_strided_slice %119 {offsets = [3, 0], sizes = [1, 256], strides = [1, 1]} : vector<8x256xf32> to vector<1x256xf32>
    %143 = vector.broadcast %141 : f32 to vector<1x256xf32>
    %144 = arith.mulf %143, %142 : vector<1x256xf32>
    %145 = arith.addf %138, %144 : vector<1x256xf32>
    %c4_i32_21 = arith.constant 4 : i32
    %146 = arith.addi %117, %c4_i32_21 : i32
    %147 = arith.index_cast %146 : i32 to index
    %148 = memref.load %arg2[%147] : memref<32xf32, #tpu.memory_space<smem>>
    %149 = vector.extract_strided_slice %119 {offsets = [4, 0], sizes = [1, 256], strides = [1, 1]} : vector<8x256xf32> to vector<1x256xf32>
    %150 = vector.broadcast %148 : f32 to vector<1x256xf32>
    %151 = arith.mulf %150, %149 : vector<1x256xf32>
    %152 = arith.addf %145, %151 : vector<1x256xf32>
    %c5_i32_22 = arith.constant 5 : i32
    %153 = arith.addi %117, %c5_i32_22 : i32
    %154 = arith.index_cast %153 : i32 to index
    %155 = memref.load %arg2[%154] : memref<32xf32, #tpu.memory_space<smem>>
    %156 = vector.extract_strided_slice %119 {offsets = [5, 0], sizes = [1, 256], strides = [1, 1]} : vector<8x256xf32> to vector<1x256xf32>
    %157 = vector.broadcast %155 : f32 to vector<1x256xf32>
    %158 = arith.mulf %157, %156 : vector<1x256xf32>
    %159 = arith.addf %152, %158 : vector<1x256xf32>
    %c6_i32_23 = arith.constant 6 : i32
    %160 = arith.addi %117, %c6_i32_23 : i32
    %161 = arith.index_cast %160 : i32 to index
    %162 = memref.load %arg2[%161] : memref<32xf32, #tpu.memory_space<smem>>
    %163 = vector.extract_strided_slice %119 {offsets = [6, 0], sizes = [1, 256], strides = [1, 1]} : vector<8x256xf32> to vector<1x256xf32>
    %164 = vector.broadcast %162 : f32 to vector<1x256xf32>
    %165 = arith.mulf %164, %163 : vector<1x256xf32>
    %166 = arith.addf %159, %165 : vector<1x256xf32>
    %c7_i32_24 = arith.constant 7 : i32
    %167 = arith.addi %117, %c7_i32_24 : i32
    %168 = arith.index_cast %167 : i32 to index
    %169 = memref.load %arg2[%168] : memref<32xf32, #tpu.memory_space<smem>>
    %170 = vector.extract_strided_slice %119 {offsets = [7, 0], sizes = [1, 256], strides = [1, 1]} : vector<8x256xf32> to vector<1x256xf32>
    %171 = vector.broadcast %169 : f32 to vector<1x256xf32>
    %172 = arith.mulf %171, %170 : vector<1x256xf32>
    %173 = arith.addf %166, %172 : vector<1x256xf32>
    %cst = arith.constant 0.000000e+00 : f32
    %174 = vector.broadcast %cst : f32 to vector<5x256xf32>
    %175 = tpu.concatenate %57, %115, %173, %174 in 0 : vector<1x256xf32>, vector<1x256xf32>, vector<1x256xf32>, vector<5x256xf32> -> vector<8x256xf32>
    %c0_25 = arith.constant 0 : index
    %c0_26 = arith.constant 0 : index
    %176 = vector.load %arg4[%c0_25, %c0_26] : memref<8x256xf32, #tpu.memory_space<vmem>>, vector<8x256xf32>
    tpu.vector_store %arg4[%c0_25, %c0_26], %175 {strides = array<i32>} : memref<8x256xf32, #tpu.memory_space<vmem>>, vector<8x256xf32>,
    return
  }
  func.func @transform_0(%arg0: i32) -> i32 {
    %c0_i32 = arith.constant 0 : i32
    %c0_i32_0 = arith.constant 0 : i32
    return %c0_i32 : i32
  }
  func.func @transform_1(%arg0: i32) -> i32 {
    %c0_i32 = arith.constant 0 : i32
    %c0_i32_0 = arith.constant 0 : i32
    return %c0_i32 : i32
  }
  func.func @transform_2(%arg0: i32) -> (i32, i32, i32) {
    %c0_i32 = arith.constant 0 : i32
    %c0_i32_0 = arith.constant 0 : i32
    %c0_i32_1 = arith.constant 0 : i32
    %c0_i32_2 = arith.constant 0 : i32
    return %c0_i32, %c0_i32_0, %c0_i32_1 : i32, i32, i32
  }
  func.func @transform_3(%arg0: i32) -> (i32, i32) {
    %c0_i32 = arith.constant 0 : i32
    %c0_i32_0 = arith.constant 0 : i32
    %c0_i32_1 = arith.constant 0 : i32
    return %c0_i32, %c0_i32_0 : i32, i32
  }
}

</mosaic_0001>

<bundles_post_ra>
// kernel: squeeze.4
= control target key start
LH: loop header
LB: loop body
LE: loop exit
PB: predicated region body
PF: predicated region fallthrough
CT: control target
= control target key end

     0   :  { %s130_s0 = inlined_call_operand.vmem [shape: f32[256], index: 0, kind: input, shape index: {}]   ;;  %s131_s1 = inlined_call_operand.hbm [shape: f32[16,16], index: 1, kind: output, shape index: {}]  }
   0x1   :  { %v5_v0 = vld [vmem:[%s130_s0] sm:$0x3] }
   0x2   :  { %6 = vst [vmem:[#allocation2] sm:$0x3] %v5_v0 }
   0x3   :  { %2 = vsyncpa [#allocation1], 0  ;;  %s98_s0 = smov 112   ;;  %s99_s8 = smov 80   ;;  %vm8_vm0 = vcmask 130048  }
   0x4   :  { %s100_s9 = smov 48   ;;  %s101_s10 = smov 96  }
   0x5   :  { %s102_s11 = smov 64   ;;  %s103_s12 = smov 32  }
   0x6   :  { %s104_s13 = smov 16   ;;  %s105_s14 = smov [#allocation0]  }
   0x7   :  { %s55_s15 = sshll.u32 %s105_s14, 4  ;;  %s57_s1 = sshll.u32 %s131_s1, 4  ;;  %s56_s15 = int_to_ptr.vmem [resolvable:$true] %s55_s15  ;;  %s58_s1 = int_to_ptr.hbm [resolvable:$true] %s57_s1 }
   0x9   :  { %v10_v1 = vld [vmem:[#allocation2] sm:$0x3]  }
   0xa   :  { %v22_v2 = vld [vmem:[#allocation2] sm:$0x3]   ;;  %11 = vrot.lane.b32.xlu0 %v10_v1, %s98_s0 }
   0xb   :  { %23 = vrot.lane.b32.xlu1 %v22_v2, %s99_s8  ;;  %v34_v3 = vld [vmem:[#allocation2] sm:$0x3]  }
   0xc   :  { %35 = vrot.lane.b32.xlu2 %v34_v3, %s100_s9  ;;  %v16_v4 = vld [vmem:[#allocation2] sm:$0x3]  }
   0xd   :  { %v28_v5 = vld [vmem:[#allocation2] sm:$0x3]  }
   0xe   :  { %v40_v6 = vld [vmem:[#allocation2] sm:$0x3]  }
   0xf   :  { %v46_v7 = vld [vmem:[#allocation2] sm:$0x3]  }
  0x10   :  { %v7_v9 = vld [vmem:[#allocation2] sm:$0x3]  }
  0x11   :  { %9 = vst.msk [vmem:[#allocation0] ss:$8 sm:$0x3] %vm8_vm0, %v7_v9  }
  0x12   :  { %17 = vrot.lane.b32.xlu0 %v16_v4, %s101_s10 }
  0x13   :  { %29 = vrot.lane.b32.xlu1 %v28_v5, %s102_s11 }
  0x14   :  { %41 = vrot.lane.b32.xlu2 %v40_v6, %s103_s12 }
  0x1a   :  { %47 = vrot.lane.b32.xlu0 %v46_v7, %s104_s13 }
  0x66   :  { %v36_v8 = vpop.permute.xlu2 %35  }
  0x67   :  { %39 = vst.msk [vmem:[#allocation0 + $0x5] ss:$8 sm:$0x3] %vm8_vm0, %v36_v8  }
  0x6e   :  { %v42_v10 = vpop.permute.xlu2 %41  }
  0x6f   :  { %45 = vst.msk [vmem:[#allocation0 + $0x6] ss:$8 sm:$0x3] %vm8_vm0, %v42_v10  }
  0x7c   :  { %v12_v11 = vpop.permute.xlu0 %11  }
  0x7d   :  { %v24_v12 = vpop.permute.xlu1 %23   ;;  %15 = vst.msk [vmem:[#allocation0 + $0x1] ss:$8 sm:$0x3] %vm8_vm0, %v12_v11  }
  0x7e   :  { %27 = vst.msk [vmem:[#allocation0 + $0x3] ss:$8 sm:$0x3] %vm8_vm0, %v24_v12  }
  0x84   :  { %v18_v13 = vpop.permute.xlu0 %17  }
  0x85   :  { %v30_v14 = vpop.permute.xlu1 %29   ;;  %21 = vst.msk [vmem:[#allocation0 + $0x2] ss:$8 sm:$0x3] %vm8_vm0, %v18_v13  }
  0x86   :  { %33 = vst.msk [vmem:[#allocation0 + $0x4] ss:$8 sm:$0x3] %vm8_vm0, %v30_v14  }
  0x8c   :  { %v48_v15 = vpop.permute.xlu0 %47  }
  0x8d   :  { %51 = vst.msk [vmem:[#allocation0 + $0x7] ss:$8 sm:$0x3] %vm8_vm0, %v48_v15  }
  0x8e   :  { %60 = dma.vmem_to_hbm [thread:$0]  %s56_s15, 256, %s58_s1, [#allocation1]  }
  0x8f   :  { %96 = dma.done.wait [#allocation1], 256  }
  0x90   :  { %97 = vsyncadd [#allocation1], 4294967040 }
  0x91   :  { %63 = vsyncpa [#allocation1], 1 }

// kernel: _generate.1
= control target key start
LH: loop header
LB: loop body
LE: loop exit
PB: predicated region body
PF: predicated region fallthrough
CT: control target
= control target key end

     0   :  { %8 = vsyncpa [#allocation3], 0  ;;  %s577_s0 = inlined_call_operand.vmem [shape: s32[3], index: 0, kind: input, shape index: {}]   ;;  %s578_s1 = inlined_call_operand.vmem [shape: f32[32], index: 1, kind: input, shape index: {}]   ;;  %s579_s2 = inlined_call_operand.vmem [shape: f32[3,8,256], index: 2, kind: input, shape index: {}]   ;;  %s580_s3 = inlined_call_operand.vmem [shape: f32[8,256], index: 3, kind: output, shape index: {}]  }
   0x1   :  { %s15_s14 = sshll.u32 %s577_s0, 4  ;;  %s16_s14 = int_to_ptr.vmem [resolvable:$true] %s15_s14 }
   0x2   :  { %9 = vsyncpa [#allocation5], 0  ;;  %s24_s17 = sshll.u32 %s578_s1, 4  ;;  %s406_s18 = smov [#allocation2]   ;;  %s25_s17 = int_to_ptr.vmem [resolvable:$true] %s24_s17 }
   0x3   :  { %18 = dma.vmem_to_smem %s16_s14, 16, %s406_s18, [#allocation3]  }
   0x4   :  { %s407_s19 = smov [#allocation4]  }
   0x5   :  { %27 = dma.vmem_to_smem %s25_s17, 16, %s407_s19, [#allocation5]  }
   0x6   :  { %402 = dma.done.wait [#allocation3], 16  }
   0x7   :  { %403 = vsyncadd [#allocation3], 4294967280 }
   0x8   :  { %404 = dma.done.wait [#allocation5], 16  }
   0x9   :  { %405 = vsyncadd [#allocation5], 4294967280 }
   0xa   :  { %38 = sfence }
   0xb   :  { %s39_s20 = sld [smem:[#allocation2]]  ;;  %v41_v0 = vld [vmem:[%s579_s2] sm:$0xff]  ;;  %v42_v1 = vld [vmem:[%s579_s2 + $0x8] sm:$0xff]  ;;  %v490_v40 = vld [vmem:[%s579_s2 + $0x10] sm:$0xff]  ;;  %vm350_vm0 = vcmask 1040384   ;;  %vm353_vm1 = vcmask 1041408  }
   0xc   :  { %s368_s21 = sld [smem:[#allocation2 + $0x1]]  ;;  %v495_v41 = vld [vmem:[%s579_s2 + $0x18] sm:$0xff]  ;;  %vm356_vm2 = vcmask 1042432  }
   0xd   :  { %s434_s0 = sld [smem:[#allocation2 + $0x2]] }
  0x11   :  { %s367_s22 = sshll.u32 %s39_s20, 3 }
  0x12   :  { %s43_s23 = sld [smem:[#allocation4 + %s367_s22]]  ;;  %s47_s24 = sadd.s32 1, %s367_s22 }
  0x13   :  { %s48_s25 = sld [smem:[#allocation4 + %s47_s24]]  ;;  %s60_s26 = sadd.s32 2, %s367_s22 }
  0x14   :  { %s61_s1 = sld [smem:[#allocation4 + %s60_s26]]  ;;  %s73_s27 = sadd.s32 3, %s367_s22 }
  0x15   :  { %s74_s28 = sld [smem:[#allocation4 + %s73_s27]]  ;;  %s86_s29 = sadd.s32 4, %s367_s22 }
  0x16   :  { %s436_s30 = sld [smem:[#allocation4 + %s86_s29]]  ;;  %s99_s4 = sadd.s32 5, %s367_s22 }
  0x17   :  { %s444_s9 = sld [smem:[#allocation4 + %s99_s4]]  ;;  %s112_s10 = sadd.s32 6, %s367_s22 }
  0x18   :  { %v44_v2 = vstv %s43_s23  ;;  %s446_s11 = sld [smem:[#allocation4 + %s112_s10]]  ;;  %s125_s12 = sadd.s32 7, %s367_s22 }
  0x19   :  { %v45_v3 = vmul.f32 %v44_v2, %v41_v0  ;;  %v49_v4 = vstv %s48_s25  ;;  %s448_s13 = sld [smem:[#allocation4 + %s125_s12]]  ;;  %s450_s14 = sshll.u32 %s368_s21, 3  ;;  %v46_v5 = vmul.f32 %v44_v2, %v42_v1 }
  0x1a   :  { %v50_v6 = vmul.f32 %v49_v4, %v41_v0  ;;  %v51_v7 = vmul.f32 %v49_v4, %v42_v1  ;;  %v62_v8 = vstv %s61_s1  ;;  %s453_s15 = sld [smem:[#allocation4 + %s450_s14]]  ;;  %s147_s16 = sadd.s32 1, %s450_s14 }
  0x1b   :  { %v63_v9 = vmul.f32 %v62_v8, %v41_v0  ;;  %v64_v10 = vmul.f32 %v62_v8, %v42_v1  ;;  %v75_v11 = vstv %s74_s28  ;;  %s456_s17 = sld [smem:[#allocation4 + %s147_s16]]  ;;  %s160_s18 = sadd.s32 2, %s450_s14 }
  0x1c   :  { %v54_v12 = vrot.slane %v50_v6, 1  ;;  %v55_v13 = vrot.slane %v51_v7, 1  ;;  %v76_v14 = vmul.f32 %v75_v11, %v41_v0  ;;  %v77_v15 = vmul.f32 %v75_v11, %v42_v1  ;;  %s173_s19 = sadd.s32 3, %s450_s14  ;;  %s462_s20 = sld [smem:[#allocation4 + %s160_s18]] }
  0x1d   :  { %v67_v16 = vrot.slane %v63_v9, 2  ;;  %v68_v17 = vrot.slane %v64_v10, 2  ;;  %v88_v18 = vstv %s436_s30  ;;  %v101_v19 = vstv %s444_s9  ;;  %s186_s21 = sadd.s32 4, %s450_s14  ;;  %s465_s22 = sld [smem:[#allocation4 + %s173_s19]] }
  0x1e   :  { %v58_v20 = vadd.f32 %v54_v12, %v45_v3  ;;  %v59_v21 = vadd.f32 %v55_v13, %v46_v5  ;;  %v80_v22 = vrot.slane %v76_v14, 3  ;;  %v81_v23 = vrot.slane %v77_v15, 3  ;;  %s199_s23 = sadd.s32 5, %s450_s14  ;;  %s468_s24 = sld [smem:[#allocation4 + %s186_s21]] }
  0x1f   :  { %v89_v24 = vmul.f32 %v88_v18, %v41_v0  ;;  %v90_v25 = vmul.f32 %v88_v18, %v42_v1  ;;  %v102_v26 = vmul.f32 %v101_v19, %v41_v0  ;;  %v103_v27 = vmul.f32 %v101_v19, %v42_v1  ;;  %s472_s25 = sld [smem:[#allocation4 + %s199_s23]]  ;;  %s212_s26 = sadd.s32 6, %s450_s14 }
  0x20   :  { %v71_v28 = vadd.f32 %v67_v16, %v58_v20  ;;  %v72_v29 = vadd.f32 %v68_v17, %v59_v21  ;;  %v114_v30 = vstv %s446_s11  ;;  %v127_v31 = vstv %s448_s13  ;;  %s225_s1 = sadd.s32 7, %s450_s14  ;;  %s481_s27 = sshll.u32 %s434_s0, 3 }
  0x21   :  { %v93_v32 = vrot.slane %v89_v24, 4  ;;  %v94_v33 = vrot.slane %v90_v25, 4  ;;  %v475_v36 = vmul.f32 %v114_v30, %v41_v0  ;;  %v477_v37 = vmul.f32 %v114_v30, %v42_v1  ;;  %s499_s0 = sld [smem:[#allocation4 + %s212_s26]]  ;;  %s247_s6 = sadd.s32 1, %s481_s27 }
  0x22   :  { %v84_v34 = vadd.f32 %v80_v22, %v71_v28  ;;  %v85_v35 = vadd.f32 %v81_v23, %v72_v29  ;;  %v483_v38 = vmul.f32 %v127_v31, %v41_v0  ;;  %v485_v39 = vmul.f32 %v127_v31, %v42_v1  ;;  %s503_s5 = sld [smem:[#allocation4 + %s225_s1]]  ;;  %s260_s8 = sadd.s32 2, %s481_s27  ;;  %v374_v28 = vld [vmem:[%s579_s2 + $0x20] sm:$0xff]  ;;  %v375_v29 = vld [vmem:[%s579_s2 + $0x28] sm:$0xff] }
  0x23   :  { %v144_v42 = vstv %s453_s15  ;;  %v149_v43 = vstv %s456_s17  ;;  %v106_v44 = vrot.slane %v102_v26, 5  ;;  %v107_v45 = vrot.slane %v103_v27, 5  ;;  %s515_s7 = sld [smem:[#allocation4 + %s481_s27]]  ;;  %s273_s10 = sadd.s32 3, %s481_s27 }
  0x24   :  { %v97_v46 = vadd.f32 %v93_v32, %v84_v34  ;;  %v98_v47 = vadd.f32 %v94_v33, %v85_v35  ;;  %v119_v48 = vrot.slane %v475_v36, 6  ;;  %v120_v49 = vrot.slane %v477_v37, 6  ;;  %s520_s9 = sld [smem:[#allocation4 + %s247_s6]]  ;;  %s286_s11 = sadd.s32 4, %s481_s27 }
  0x25   :  { %v145_v50 = vmul.f32 %v490_v40, %v144_v42  ;;  %v146_v51 = vmul.f32 %v495_v41, %v144_v42  ;;  %v150_v52 = vmul.f32 %v490_v40, %v149_v43  ;;  %v151_v53 = vmul.f32 %v495_v41, %v149_v43  ;;  %s528_s12 = sld [smem:[#allocation4 + %s260_s8]]  ;;  %s299_s13 = sadd.s32 5, %s481_s27 }
  0x26   :  { %v132_v54 = vrot.slane %v483_v38, 7  ;;  %v133_v55 = vrot.slane %v485_v39, 7  ;;  %v162_v56 = vstv %s462_s20  ;;  %v175_v57 = vstv %s465_s22  ;;  %s531_s14 = sld [smem:[#allocation4 + %s273_s10]]  ;;  %s312_s17 = sadd.s32 6, %s481_s27 }
  0x27   :  { %v154_v58 = vrot.slane %v150_v52, 1  ;;  %v155_v59 = vrot.slane %v151_v53, 1  ;;  %v188_v60 = vstv %s468_s24  ;;  %v201_v61 = vstv %s472_s25  ;;  %s537_s15 = sld [smem:[#allocation4 + %s286_s11]]  ;;  %s325_s18 = sadd.s32 7, %s481_s27 }
  0x28   :  { %v163_v62 = vmul.f32 %v490_v40, %v162_v56  ;;  %v164_v63 = vmul.f32 %v495_v41, %v162_v56  ;;  %v176_v0 = vmul.f32 %v490_v40, %v175_v57  ;;  %v177_v1 = vmul.f32 %v495_v41, %v175_v57  ;;  %s541_s16 = sld [smem:[#allocation4 + %s299_s13]] }
  0x29   :  { %v110_v2 = vadd.f32 %v106_v44, %v97_v46  ;;  %v111_v3 = vadd.f32 %v107_v45, %v98_v47  ;;  %v158_v4 = vadd.f32 %v154_v58, %v145_v50  ;;  %v159_v5 = vadd.f32 %v155_v59, %v146_v51  ;;  %s557_s23 = sld [smem:[#allocation4 + %s312_s17]] }
  0x2a   :  { %v167_v6 = vrot.slane %v163_v62, 2  ;;  %v168_v7 = vrot.slane %v164_v63, 2  ;;  %v180_v8 = vrot.slane %v176_v0, 3  ;;  %v181_v9 = vrot.slane %v177_v1, 3  ;;  %s559_s24 = sld [smem:[#allocation4 + %s325_s18]] }
  0x2b   :  { %v189_v10 = vmul.f32 %v490_v40, %v188_v60  ;;  %v190_v11 = vmul.f32 %v495_v41, %v188_v60  ;;  %v202_v12 = vmul.f32 %v490_v40, %v201_v61  ;;  %v203_v13 = vmul.f32 %v495_v41, %v201_v61 }
  0x2c   :  { %v171_v14 = vadd.f32 %v167_v6, %v158_v4  ;;  %v172_v15 = vadd.f32 %v168_v7, %v159_v5  ;;  %v214_v16 = vstv %s499_s0  ;;  %v227_v17 = vstv %s503_s5 }
  0x2d   :  { %v193_v18 = vrot.slane %v189_v10, 4  ;;  %v194_v19 = vrot.slane %v190_v11, 4  ;;  %v206_v20 = vrot.slane %v202_v12, 5  ;;  %v207_v21 = vrot.slane %v203_v13, 5 }
  0x2e   :  { %v184_v22 = vadd.f32 %v180_v8, %v171_v14  ;;  %v185_v23 = vadd.f32 %v181_v9, %v172_v15  ;;  %v215_v24 = vmul.f32 %v490_v40, %v214_v16  ;;  %v216_v25 = vmul.f32 %v495_v41, %v214_v16 }
  0x2f   :  { %v228_v26 = vmul.f32 %v490_v40, %v227_v17  ;;  %v229_v27 = vmul.f32 %v495_v41, %v227_v17  ;;  %v244_v30 = vstv %s515_s7  ;;  %v249_v31 = vstv %s520_s9 }
  0x30   :  { %v123_v32 = vadd.f32 %v119_v48, %v110_v2  ;;  %v124_v33 = vadd.f32 %v120_v49, %v111_v3  ;;  %v197_v34 = vadd.f32 %v193_v18, %v184_v22  ;;  %v198_v35 = vadd.f32 %v194_v19, %v185_v23 }
  0x31   :  { %v219_v36 = vrot.slane %v215_v24, 6  ;;  %v220_v37 = vrot.slane %v216_v25, 6  ;;  %v245_v40 = vmul.f32 %v374_v28, %v244_v30  ;;  %v246_v41 = vmul.f32 %v375_v29, %v244_v30 }
  0x32   :  { %v210_v42 = vadd.f32 %v206_v20, %v197_v34  ;;  %v211_v43 = vadd.f32 %v207_v21, %v198_v35  ;;  %v250_v44 = vmul.f32 %v374_v28, %v249_v31  ;;  %v251_v45 = vmul.f32 %v375_v29, %v249_v31 }
  0x33   :  { %v232_v46 = vrot.slane %v228_v26, 7  ;;  %v233_v47 = vrot.slane %v229_v27, 7  ;;  %v262_v48 = vstv %s528_s12  ;;  %v275_v49 = vstv %s531_s14 }
  0x34   :  { %v254_v50 = vrot.slane %v250_v44, 1  ;;  %v255_v51 = vrot.slane %v251_v45, 1  ;;  %v288_v52 = vstv %s537_s15  ;;  %v301_v53 = vstv %s541_s16 }
  0x35   :  { %v263_v56 = vmul.f32 %v374_v28, %v262_v48  ;;  %v264_v57 = vmul.f32 %v375_v29, %v262_v48  ;;  %v276_v58 = vmul.f32 %v374_v28, %v275_v49  ;;  %v277_v59 = vmul.f32 %v375_v29, %v275_v49 }
  0x36   :  { %v223_v60 = vadd.f32 %v219_v36, %v210_v42  ;;  %v224_v61 = vadd.f32 %v220_v37, %v211_v43  ;;  %v258_v62 = vadd.f32 %v254_v50, %v245_v40  ;;  %v259_v63 = vadd.f32 %v255_v51, %v246_v41 }
  0x37   :  { %v267_v0 = vrot.slane %v263_v56, 2  ;;  %v268_v1 = vrot.slane %v264_v57, 2  ;;  %v280_v2 = vrot.slane %v276_v58, 3  ;;  %v281_v3 = vrot.slane %v277_v59, 3 }
  0x38   :  { %v289_v4 = vmul.f32 %v374_v28, %v288_v52  ;;  %v290_v5 = vmul.f32 %v375_v29, %v288_v52  ;;  %v302_v6 = vmul.f32 %v374_v28, %v301_v53  ;;  %v303_v7 = vmul.f32 %v375_v29, %v301_v53 }
  0x39   :  { %v271_v8 = vadd.f32 %v267_v0, %v258_v62  ;;  %v272_v9 = vadd.f32 %v268_v1, %v259_v63  ;;  %v314_v10 = vstv %s557_s23  ;;  %v327_v11 = vstv %s559_s24 }
  0x3a   :  { %v293_v12 = vrot.slane %v289_v4, 4  ;;  %v294_v13 = vrot.slane %v290_v5, 4  ;;  %v306_v14 = vrot.slane %v302_v6, 5  ;;  %v307_v15 = vrot.slane %v303_v7, 5 }
  0x3b   :  { %v284_v16 = vadd.f32 %v280_v2, %v271_v8  ;;  %v285_v17 = vadd.f32 %v281_v3, %v272_v9  ;;  %v315_v18 = vmul.f32 %v374_v28, %v314_v10  ;;  %v316_v19 = vmul.f32 %v375_v29, %v314_v10 }
  0x3c   :  { %v236_v20 = vadd.f32 %v232_v46, %v223_v60  ;;  %v237_v21 = vadd.f32 %v233_v47, %v224_v61  ;;  %v328_v22 = vmul.f32 %v374_v28, %v327_v11  ;;  %v329_v23 = vmul.f32 %v375_v29, %v327_v11 }
  0x3d   :  { %v297_v24 = vadd.f32 %v293_v12, %v284_v16  ;;  %v298_v25 = vadd.f32 %v294_v13, %v285_v17  ;;  %v319_v26 = vrot.slane %v315_v18, 6  ;;  %v320_v27 = vrot.slane %v316_v19, 6 }
  0x3e   :  { %v332_v34 = vrot.slane %v328_v22, 7  ;;  %v333_v35 = vrot.slane %v329_v23, 7  ;;  %v136_v36 = vadd.f32 %v132_v54, %v123_v32  ;;  %v137_v37 = vadd.f32 %v133_v55, %v124_v33 }
  0x3f   :  { %v310_v30 = vadd.f32 %v306_v14, %v297_v24  ;;  %v311_v31 = vadd.f32 %v307_v15, %v298_v25  ;;  %v340_v40 = vrot.slane %v236_v20, 7  ;;  %v341_v41 = vrot.slane %v237_v21, 7 }
  0x41   :  { %v323_v42 = vadd.f32 %v319_v26, %v310_v30  ;;  %v324_v43 = vadd.f32 %v320_v27, %v311_v31  ;;  %v351_v44 = vsel %vm350_vm0, %v136_v36, %v340_v40  ;;  %v352_v45 = vsel %vm350_vm0, %v137_v37, %v341_v41 }
  0x43   :  { %v336_v28 = vadd.f32 %v332_v34, %v323_v42  ;;  %v337_v29 = vadd.f32 %v333_v35, %v324_v43 }
  0x45   :  { %v346_v46 = vrot.slane %v336_v28, 6  ;;  %v347_v47 = vrot.slane %v337_v29, 6 }
  0x47   :  { %v354_v48 = vsel %vm353_vm1, %v351_v44, %v346_v46  ;;  %v355_v49 = vsel %vm353_vm1, %v352_v45, %v347_v47 }
  0x48   :  { %v357_v38 = vsel %vm356_vm2, %v354_v48, 0.0  ;;  %v358_v54 = vsel %vm356_vm2, %v355_v49, 0.0 }
  0x49   :  { %359 = vst [vmem:[%s580_s3] sm:$0xff] %v357_v38 }
  0x4a   :  { %360 = vst [vmem:[%s580_s3 + $0x8] sm:$0xff] %v358_v54 }
  0x4b   :  { %365 = vsyncpa [#allocation3], 1 }
  0x4c   :  { %366 = vsyncpa [#allocation5], 1 }

</bundles_post_ra>
